<compile_context>
chip_gen: v6e
topology: v6e:2x2x1
jax: 0.10.0
libtpu: 0.0.40
codegen_flags: <defaults>
</compile_context>

<pallas_src>
import functools
import math

import jax
import jax.numpy as jnp
from jax.experimental import pallas as pl
from jax.experimental.pallas import tpu as pltpu


# ----------------------------- helpers ----------------------------------------
def _round_up(x, m):
    return ((x + m - 1) // m) * m


def bezier_weights(t, num_bends):
    """Bezier.forward: binom * t**k * (1-t)**(n-1-k)  -> (num_bends,) f32 (glue)."""
    k = jnp.arange(num_bends, dtype=jnp.float32)
    rev = jnp.arange(num_bends - 1, -1, -1, dtype=jnp.float32)
    binom = jnp.array(
        [math.comb(num_bends - 1, i) for i in range(num_bends)], dtype=jnp.float32
    )
    t = jnp.asarray(t, dtype=jnp.float32)
    return binom * jnp.power(t, k) * jnp.power(1.0 - t, rev)


def _choose_tile_b(batch, pref=512):
    """Batch tile: multiple of 8 dividing the padded batch, capped at `pref`
    (mem-bound sweet spot ~512), reduced when needed so the batch grid has >=2
    steps and dimension_semantics=('parallel',) can use v7x's second core."""
    padded = _round_up(batch, 8)
    divs = [d for d in range(8, padded + 1, 8) if padded % d == 0]
    cands = [d for d in divs if d <= pref] or [8]
    tile = max(cands)
    if padded // tile < 2:
        two_step = [d for d in cands if padded // d >= 2]
        if two_step:
            tile = max(two_step)
    return tile, padded


# ----------------------------- one-time parameter setup ------------------------
def prepare_curve_params(w1_stack, b1_stack, w2_stack, b2_stack):
    """Pad bend stacks lane/sublane dense ONCE (not per forward) and store the
    matmul weight stacks in bf16 (halves their HBM/DMA bytes).  Biases stay f32."""
    nb, in_dim, hid_dim = w1_stack.shape
    out_dim = w2_stack.shape[-1]
    IN, HID, OUT = (_round_up(d, 128) for d in (in_dim, hid_dim, out_dim))
    w1p = jnp.zeros((nb, IN, HID), jnp.bfloat16).at[:, :in_dim, :hid_dim].set(
        w1_stack.astype(jnp.bfloat16))
    b1p = jnp.zeros((nb, 1, HID), jnp.float32).at[:, :, :hid_dim].set(b1_stack)
    w2p = jnp.zeros((nb, HID, OUT), jnp.bfloat16).at[:, :hid_dim, :out_dim].set(
        w2_stack.astype(jnp.bfloat16))
    b2p = jnp.zeros((nb, 1, OUT), jnp.float32).at[:, :, :out_dim].set(b2_stack)
    return w1p, b1p, w2p, b2p


# ------------------ fused kernel: interpolation + MLP per batch tile -----------
def fused_curve_mlp_kernel(cw_ref, x_ref, w1s_ref, b1s_ref, w2s_ref, b2s_ref, o_ref):
    """One batch tile of: theta = sum_k w_k * theta_k ; Linear -> ReLU -> Linear.

    cw_ref  : SMEM (nb,)             Bezier coefficients
    x_ref   : VMEM (tile_b, IN)      bf16, pipelined per tile
    w1s_ref : VMEM (nb, IN, HID)     bf16 bend stack, VMEM-resident
    b1s_ref : VMEM (nb, 1, HID)      f32 bend stack
    w2s_ref : VMEM (nb, HID, OUT)    bf16 bend stack, VMEM-resident
    b2s_ref : VMEM (nb, 1, OUT)      f32 bend stack
    o_ref   : VMEM (tile_b, OUT)     f32
    """
    nb = w1s_ref.shape[0]

    def wsum(stack_ref):
        # num_bends is static & tiny -> fully unrolled; f32 accumulation.
        acc = cw_ref[0] * stack_ref[0].astype(jnp.float32)
        for k in range(1, nb):
            acc = acc + cw_ref[k] * stack_ref[k].astype(jnp.float32)
        return acc

    w1 = wsum(w1s_ref).astype(jnp.bfloat16)   # VPU work, hidden under MXU slack
    b1 = wsum(b1s_ref)
    w2 = wsum(w2s_ref).astype(jnp.bfloat16)
    b2 = wsum(b2s_ref)

    h = jnp.dot(x_ref[...], w1, preferred_element_type=jnp.float32)
    h = jnp.maximum(h + b1, 0.0).astype(jnp.bfloat16)
    o = jnp.dot(h, w2, preferred_element_type=jnp.float32) + b2
    o_ref[...] = o.astype(o_ref.dtype)


def fused_curve_mlp(cw, xp, w1s, b1s, w2s, b2s, tile_b):
    B, IN = xp.shape
    nb, _, HID = w1s.shape
    OUT = w2s.shape[-1]
    grid = (B // tile_b,)
    flops = 2 * B * (IN * HID + HID * OUT) + 2 * nb * (IN * HID + HID * OUT)
    bytes_accessed = (B * IN * 2 + nb * (IN * HID + HID * OUT) * 2
                      + nb * (HID + OUT) * 4 + B * OUT * 4)
    return pl.pallas_call(
        fused_curve_mlp_kernel,
        out_shape=jax.ShapeDtypeStruct((B, OUT), jnp.float32),
        grid_spec=pltpu.PrefetchScalarGridSpec(
            num_scalar_prefetch=0,
            grid=grid,
            in_specs=[
                pl.BlockSpec(memory_space=pltpu.MemorySpace.SMEM),      # cw
                pl.BlockSpec((tile_b, IN), lambda i: (i, 0)),           # x: per tile
                pl.BlockSpec((nb, IN, HID), lambda i: (0, 0, 0)),       # resident
                pl.BlockSpec((nb, 1, HID), lambda i: (0, 0, 0)),        # resident
                pl.BlockSpec((nb, HID, OUT), lambda i: (0, 0, 0)),      # resident
                pl.BlockSpec((nb, 1, OUT), lambda i: (0, 0, 0)),        # resident
            ],
            out_specs=pl.BlockSpec((tile_b, OUT), lambda i: (i, 0)),
        ),
        compiler_params=pltpu.CompilerParams(
            dimension_semantics=("parallel",)),
        cost_estimate=pl.CostEstimate(
            flops=flops, transcendentals=0, bytes_accessed=bytes_accessed),
    )(cw, xp, w1s, b1s, w2s, b2s)


# ------------------ fallback (large weights): split MLP kernel -----------------
def mlp_kernel(x_ref, w1_ref, b1_ref, w2_ref, b2_ref, o_ref):
    h = jnp.dot(x_ref[...], w1_ref[...], preferred_element_type=jnp.float32)
    h = jnp.maximum(h + b1_ref[...], 0.0).astype(jnp.bfloat16)
    o = jnp.dot(h, w2_ref[...], preferred_element_type=jnp.float32) + b2_ref[...]
    o_ref[...] = o.astype(o_ref.dtype)


def mlp_forward(xp, w1, b1, w2, b2, tile_b, vmem_limit_bytes=None):
    B, IN = xp.shape
    HID = w1.shape[1]
    OUT = w2.shape[1]
    return pl.pallas_call(
        mlp_kernel,
        out_shape=jax.ShapeDtypeStruct((B, OUT), jnp.float32),
        grid_spec=pltpu.PrefetchScalarGridSpec(
            num_scalar_prefetch=0,
            grid=(B // tile_b,),
            in_specs=[
                pl.BlockSpec((tile_b, IN), lambda i: (i, 0)),
                pl.BlockSpec((IN, HID), lambda i: (0, 0)),
                pl.BlockSpec((1, HID), lambda i: (0, 0)),
                pl.BlockSpec((HID, OUT), lambda i: (0, 0)),
                pl.BlockSpec((1, OUT), lambda i: (0, 0)),
            ],
            out_specs=pl.BlockSpec((tile_b, OUT), lambda i: (i, 0)),
        ),
        compiler_params=pltpu.CompilerParams(
            dimension_semantics=("parallel",),
            vmem_limit_bytes=vmem_limit_bytes),
        cost_estimate=pl.CostEstimate(
            flops=2 * B * (IN * HID + HID * OUT),
            transcendentals=0,
            bytes_accessed=(B * IN * 2 + (IN * HID + HID * OUT) * 2
                            + (HID + OUT) * 4 + B * OUT * 4)),
    )(xp, w1, b1, w2, b2)


# ----------------------------- full forward (wrapper) --------------------------
# Conservative: fits the default scoped VMEM limit on v5e/v6e/v7x even with the
# default 2x buffering of the constant-index resident bend stacks.
_FUSED_VMEM_BUDGET = 24 << 20


def _fused_vmem_bytes(nb, tile_b, IN, HID, OUT):
    stacks = nb * (IN * HID + HID * OUT) * 2 + nb * (HID + OUT) * 4
    io = tile_b * IN * 2 + tile_b * OUT * 4
    temps = (IN * HID + HID * OUT) * 4 + tile_b * HID * 4
    return 2 * (stacks + io) + temps


@functools.partial(jax.jit, static_argnames=("out_dim", "tile_b"))
def curve_model_forward(t, x, w1p, b1p, w2p, b2p, *, out_dim, tile_b=512):
    """CurveModel.forward (training branch): coeffs -> interpolate -> final model.

    w1p/b1p/w2p/b2p are the pre-padded bend stacks from prepare_curve_params()
    (padding is a one-time setup cost, not a per-forward cost)."""
    nb = w1p.shape[0]
    cw = bezier_weights(t, nb)                    # (nb,), tiny glue

    batch, in_dim = x.shape
    IN, HID = w1p.shape[1], w1p.shape[2]
    OUT = w2p.shape[2]
    TILE_B, B = _choose_tile_b(batch, pref=tile_b)

    # Only the per-call input x is padded in the forward path, directly as bf16.
    xp = jnp.zeros((B, IN), jnp.bfloat16).at[:batch, :in_dim].set(
        x.astype(jnp.bfloat16))

    if _fused_vmem_bytes(nb, TILE_B, IN, HID, OUT) <= _FUSED_VMEM_BUDGET:
        outp = fused_curve_mlp(cw, xp, w1p, b1p, w2p, b2p, TILE_B)
    else:
        # Big-weight fallback: single fused XLA weighted-sum per tensor (no extra
        # pallas launches), then weight-resident MLP kernel.
        w1 = jnp.einsum("k,kio->io", cw, w1p).astype(jnp.bfloat16)
        b1 = jnp.einsum("k,kio->io", cw, b1p)
        w2 = jnp.einsum("k,kio->io", cw, w2p).astype(jnp.bfloat16)
        b2 = jnp.einsum("k,kio->io", cw, b2p)
        need = (2 * ((IN * HID + HID * OUT) * 2 + (HID + OUT) * 4
                     + TILE_B * (IN * 2 + OUT * 4)) + TILE_B * HID * 4)
        vmem_limit = min(max(need + (8 << 20), 32 << 20), 96 << 20)
        # TODO(synk): tile HID/OUT inside mlp_kernel when weights exceed ~48 MiB
        # (v7x has only 64 MiB physical VMEM per TensorCore).
        outp = mlp_forward(xp, w1, b1, w2, b2, TILE_B,
                           vmem_limit_bytes=vmem_limit)
    return outp[:batch, :out_dim]


# ----------------------------- reference (pure JAX) ----------------------------
def _reference(t, x, w1_stack, b1_stack, w2_stack, b2_stack, num_bends):
    # Mirrors the kernel numerics (bf16 stacks/matmul inputs, f32 accumulation).
    cw = bezier_weights(t, num_bends)
    w1 = jnp.einsum("k,kio->io", cw, w1_stack.astype(jnp.bfloat16)).astype(jnp.bfloat16)
    b1 = jnp.einsum("k,kio->io", cw, b1_stack)
    w2 = jnp.einsum("k,kio->io", cw, w2_stack.astype(jnp.bfloat16)).astype(jnp.bfloat16)
    b2 = jnp.einsum("k,kio->io", cw, b2_stack)
    h = jnp.dot(x.astype(jnp.bfloat16), w1, preferred_element_type=jnp.float32) + b1
    h = jnp.maximum(h, 0.0).astype(jnp.bfloat16)
    return jnp.dot(h, w2, preferred_element_type=jnp.float32) + b2


# ----------------------------- main --------------------------------------------
if __name__ == "__main__":
    num_bends = 3          # start, one midpoint bend, end
    batch, in_dim, hid_dim, out_dim = 2, 16, 32, 8

    key = jax.random.PRNGKey(0)
    keys = jax.random.split(key, 6)

    # Deterministic per-bend parameter sets (one MLP per bend: start / mid / end).
    x = jax.random.normal(keys[0], (batch, in_dim), dtype=jnp.float32)
    w1_stack = jax.random.normal(keys[1], (num_bends, in_dim, hid_dim), jnp.float32) * 0.1
    b1_stack = jax.random.normal(keys[2], (num_bends, 1, hid_dim), jnp.float32) * 0.1
    w2_stack = jax.random.normal(keys[3], (num_bends, hid_dim, out_dim), jnp.float32) * 0.1
    b2_stack = jax.random.normal(keys[4], (num_bends, 1, out_dim), jnp.float32) * 0.1

    # Scalar curve position t in [0, 1) (torch.rand(1) in training mode).
    t = jax.random.uniform(keys[5], (), dtype=jnp.float32)

    # One-time setup (pad + bf16-cast bend stacks); hoisted out of the forward.
    w1p, b1p, w2p, b2p = prepare_curve_params(w1_stack, b1_stack, w2_stack, b2_stack)

    out = curve_model_forward(t, x, w1p, b1p, w2p, b2p, out_dim=out_dim)
    out = jax.block_until_ready(out)

    ref = _reference(t, x, w1_stack, b1_stack, w2_stack, b2_stack, num_bends)
    assert out.shape == (batch, out_dim)
    assert jnp.allclose(out, ref, atol=1e-2, rtol=1e-2), "mismatch vs reference"

    # TODO(synk): HuggingFace checkpoint loading / LoRA (peft) wrapping has no
    # Pallas equivalent; per-bend parameters are synthesized in-script instead.
    print("KERNEL_OK")
</pallas_src>

<mosaic_0001>
module attributes {stable_mosaic.version = 11 : i64} {
  func.func @fused_curve_mlp_kernel(%arg0: i32, %arg1: memref<3xf32, #tpu.memory_space<smem>>, %arg2: memref<8x128xbf16, #tpu.memory_space<vmem>>, %arg3: memref<3x128x128xbf16, #tpu.memory_space<vmem>>, %arg4: memref<3x1x128xf32, #tpu.memory_space<vmem>>, %arg5: memref<3x128x128xbf16, #tpu.memory_space<vmem>>, %arg6: memref<3x1x128xf32, #tpu.memory_space<vmem>>, %arg7: memref<8x128xf32, #tpu.memory_space<vmem>>) attributes {dimension_semantics = [#tpu.dimension_semantics<parallel>], iteration_bounds = array<i64: 1>, scalar_prefetch = 0 : i64, scratch_operands = 0 : i64, tpu.core_type = #tpu.core_type<tc>, window_params = [{transform_indices = @transform_0, window_bounds = array<i64: 3>}, {transform_indices = @transform_1, window_bounds = array<i64: 8, 128>}, {pipeline_mode = #tpu.pipeline_mode<synchronous>, transform_indices = @transform_2, window_bounds = array<i64: 3, 128, 128>}, {pipeline_mode = #tpu.pipeline_mode<synchronous>, transform_indices = @transform_3, window_bounds = array<i64: 3, 1, 128>}, {pipeline_mode = #tpu.pipeline_mode<synchronous>, transform_indices = @transform_4, window_bounds = array<i64: 3, 128, 128>}, {pipeline_mode = #tpu.pipeline_mode<synchronous>, transform_indices = @transform_5, window_bounds = array<i64: 3, 1, 128>}, {transform_indices = @transform_6, window_bounds = array<i64: 8, 128>}]} {
    %c0 = arith.constant 0 : index
    %0 = memref.load %arg1[%c0] : memref<3xf32, #tpu.memory_space<smem>>
    %c0_0 = arith.constant 0 : index
    %c0_1 = arith.constant 0 : index
    %c0_2 = arith.constant 0 : index
    %1 = vector.load %arg3[%c0_0, %c0_1, %c0_2] : memref<3x128x128xbf16, #tpu.memory_space<vmem>>, vector<1x128x128xbf16>
    %2 = vector.shape_cast %1 : vector<1x128x128xbf16> to vector<128x128xbf16>
    %3 = arith.extf %2 : vector<128x128xbf16> to vector<128x128xf32>
    %4 = vector.broadcast %0 : f32 to vector<128x128xf32>
    %5 = arith.mulf %4, %3 : vector<128x128xf32>
    %c1 = arith.constant 1 : index
    %6 = memref.load %arg1[%c1] : memref<3xf32, #tpu.memory_space<smem>>
    %c1_3 = arith.constant 1 : index
    %c0_4 = arith.constant 0 : index
    %c0_5 = arith.constant 0 : index
    %7 = vector.load %arg3[%c1_3, %c0_4, %c0_5] : memref<3x128x128xbf16, #tpu.memory_space<vmem>>, vector<1x128x128xbf16>
    %8 = vector.shape_cast %7 : vector<1x128x128xbf16> to vector<128x128xbf16>
    %9 = arith.extf %8 : vector<128x128xbf16> to vector<128x128xf32>
    %10 = vector.broadcast %6 : f32 to vector<128x128xf32>
    %11 = arith.mulf %10, %9 : vector<128x128xf32>
    %12 = arith.addf %5, %11 : vector<128x128xf32>
    %c2 = arith.constant 2 : index
    %13 = memref.load %arg1[%c2] : memref<3xf32, #tpu.memory_space<smem>>
    %c2_6 = arith.constant 2 : index
    %c0_7 = arith.constant 0 : index
    %c0_8 = arith.constant 0 : index
    %14 = vector.load %arg3[%c2_6, %c0_7, %c0_8] : memref<3x128x128xbf16, #tpu.memory_space<vmem>>, vector<1x128x128xbf16>
    %15 = vector.shape_cast %14 : vector<1x128x128xbf16> to vector<128x128xbf16>
    %16 = arith.extf %15 : vector<128x128xbf16> to vector<128x128xf32>
    %17 = vector.broadcast %13 : f32 to vector<128x128xf32>
    %18 = arith.mulf %17, %16 : vector<128x128xf32>
    %19 = arith.addf %12, %18 : vector<128x128xf32>
    %20 = arith.truncf %19 : vector<128x128xf32> to vector<128x128xbf16>
    %c0_9 = arith.constant 0 : index
    %21 = memref.load %arg1[%c0_9] : memref<3xf32, #tpu.memory_space<smem>>
    %c0_10 = arith.constant 0 : index
    %c0_11 = arith.constant 0 : index
    %c0_12 = arith.constant 0 : index
    %22 = vector.load %arg4[%c0_10, %c0_11, %c0_12] : memref<3x1x128xf32, #tpu.memory_space<vmem>>, vector<1x1x128xf32>
    %23 = vector.shape_cast %22 : vector<1x1x128xf32> to vector<1x128xf32>
    %24 = vector.broadcast %21 : f32 to vector<1x128xf32>
    %25 = arith.mulf %24, %23 : vector<1x128xf32>
    %c1_13 = arith.constant 1 : index
    %26 = memref.load %arg1[%c1_13] : memref<3xf32, #tpu.memory_space<smem>>
    %c1_14 = arith.constant 1 : index
    %c0_15 = arith.constant 0 : index
    %c0_16 = arith.constant 0 : index
    %27 = vector.load %arg4[%c1_14, %c0_15, %c0_16] : memref<3x1x128xf32, #tpu.memory_space<vmem>>, vector<1x1x128xf32>
    %28 = vector.shape_cast %27 : vector<1x1x128xf32> to vector<1x128xf32>
    %29 = vector.broadcast %26 : f32 to vector<1x128xf32>
    %30 = arith.mulf %29, %28 : vector<1x128xf32>
    %31 = arith.addf %25, %30 : vector<1x128xf32>
    %c2_17 = arith.constant 2 : index
    %32 = memref.load %arg1[%c2_17] : memref<3xf32, #tpu.memory_space<smem>>
    %c2_18 = arith.constant 2 : index
    %c0_19 = arith.constant 0 : index
    %c0_20 = arith.constant 0 : index
    %33 = vector.load %arg4[%c2_18, %c0_19, %c0_20] : memref<3x1x128xf32, #tpu.memory_space<vmem>>, vector<1x1x128xf32>
    %34 = vector.shape_cast %33 : vector<1x1x128xf32> to vector<1x128xf32>
    %35 = vector.broadcast %32 : f32 to vector<1x128xf32>
    %36 = arith.mulf %35, %34 : vector<1x128xf32>
    %37 = arith.addf %31, %36 : vector<1x128xf32>
    %c0_21 = arith.constant 0 : index
    %38 = memref.load %arg1[%c0_21] : memref<3xf32, #tpu.memory_space<smem>>
    %c0_22 = arith.constant 0 : index
    %c0_23 = arith.constant 0 : index
    %c0_24 = arith.constant 0 : index
    %39 = vector.load %arg5[%c0_22, %c0_23, %c0_24] : memref<3x128x128xbf16, #tpu.memory_space<vmem>>, vector<1x128x128xbf16>
    %40 = vector.shape_cast %39 : vector<1x128x128xbf16> to vector<128x128xbf16>
    %41 = arith.extf %40 : vector<128x128xbf16> to vector<128x128xf32>
    %42 = vector.broadcast %38 : f32 to vector<128x128xf32>
    %43 = arith.mulf %42, %41 : vector<128x128xf32>
    %c1_25 = arith.constant 1 : index
    %44 = memref.load %arg1[%c1_25] : memref<3xf32, #tpu.memory_space<smem>>
    %c1_26 = arith.constant 1 : index
    %c0_27 = arith.constant 0 : index
    %c0_28 = arith.constant 0 : index
    %45 = vector.load %arg5[%c1_26, %c0_27, %c0_28] : memref<3x128x128xbf16, #tpu.memory_space<vmem>>, vector<1x128x128xbf16>
    %46 = vector.shape_cast %45 : vector<1x128x128xbf16> to vector<128x128xbf16>
    %47 = arith.extf %46 : vector<128x128xbf16> to vector<128x128xf32>
    %48 = vector.broadcast %44 : f32 to vector<128x128xf32>
    %49 = arith.mulf %48, %47 : vector<128x128xf32>
    %50 = arith.addf %43, %49 : vector<128x128xf32>
    %c2_29 = arith.constant 2 : index
    %51 = memref.load %arg1[%c2_29] : memref<3xf32, #tpu.memory_space<smem>>
    %c2_30 = arith.constant 2 : index
    %c0_31 = arith.constant 0 : index
    %c0_32 = arith.constant 0 : index
    %52 = vector.load %arg5[%c2_30, %c0_31, %c0_32] : memref<3x128x128xbf16, #tpu.memory_space<vmem>>, vector<1x128x128xbf16>
    %53 = vector.shape_cast %52 : vector<1x128x128xbf16> to vector<128x128xbf16>
    %54 = arith.extf %53 : vector<128x128xbf16> to vector<128x128xf32>
    %55 = vector.broadcast %51 : f32 to vector<128x128xf32>
    %56 = arith.mulf %55, %54 : vector<128x128xf32>
    %57 = arith.addf %50, %56 : vector<128x128xf32>
    %58 = arith.truncf %57 : vector<128x128xf32> to vector<128x128xbf16>
    %c0_33 = arith.constant 0 : index
    %59 = memref.load %arg1[%c0_33] : memref<3xf32, #tpu.memory_space<smem>>
    %c0_34 = arith.constant 0 : index
    %c0_35 = arith.constant 0 : index
    %c0_36 = arith.constant 0 : index
    %60 = vector.load %arg6[%c0_34, %c0_35, %c0_36] : memref<3x1x128xf32, #tpu.memory_space<vmem>>, vector<1x1x128xf32>
    %61 = vector.shape_cast %60 : vector<1x1x128xf32> to vector<1x128xf32>
    %62 = vector.broadcast %59 : f32 to vector<1x128xf32>
    %63 = arith.mulf %62, %61 : vector<1x128xf32>
    %c1_37 = arith.constant 1 : index
    %64 = memref.load %arg1[%c1_37] : memref<3xf32, #tpu.memory_space<smem>>
    %c1_38 = arith.constant 1 : index
    %c0_39 = arith.constant 0 : index
    %c0_40 = arith.constant 0 : index
    %65 = vector.load %arg6[%c1_38, %c0_39, %c0_40] : memref<3x1x128xf32, #tpu.memory_space<vmem>>, vector<1x1x128xf32>
    %66 = vector.shape_cast %65 : vector<1x1x128xf32> to vector<1x128xf32>
    %67 = vector.broadcast %64 : f32 to vector<1x128xf32>
    %68 = arith.mulf %67, %66 : vector<1x128xf32>
    %69 = arith.addf %63, %68 : vector<1x128xf32>
    %c2_41 = arith.constant 2 : index
    %70 = memref.load %arg1[%c2_41] : memref<3xf32, #tpu.memory_space<smem>>
    %c2_42 = arith.constant 2 : index
    %c0_43 = arith.constant 0 : index
    %c0_44 = arith.constant 0 : index
    %71 = vector.load %arg6[%c2_42, %c0_43, %c0_44] : memref<3x1x128xf32, #tpu.memory_space<vmem>>, vector<1x1x128xf32>
    %72 = vector.shape_cast %71 : vector<1x1x128xf32> to vector<1x128xf32>
    %73 = vector.broadcast %70 : f32 to vector<1x128xf32>
    %74 = arith.mulf %73, %72 : vector<1x128xf32>
    %75 = arith.addf %69, %74 : vector<1x128xf32>
    %c0_45 = arith.constant 0 : index
    %c0_46 = arith.constant 0 : index
    %76 = vector.load %arg2[%c0_45, %c0_46] : memref<8x128xbf16, #tpu.memory_space<vmem>>, vector<8x128xbf16>
    %cst = arith.constant dense<0.000000e+00> : vector<8x128xf32>
    %77 = tpu.matmul %76, %20, %cst {dimension_numbers = #tpu.dot_dimension_numbers<[1], [0], [0], [1], [0, 0, 1, 1], [], []>} : vector<8x128xbf16>, vector<128x128xbf16>, vector<8x128xf32> -> vector<8x128xf32>
    %78 = vector.broadcast %37 : vector<1x128xf32> to vector<8x128xf32>
    %79 = arith.addf %77, %78 : vector<8x128xf32>
    %cst_47 = arith.constant 0.000000e+00 : f32
    %80 = vector.broadcast %cst_47 : f32 to vector<8x128xf32>
    %81 = arith.maximumf %79, %80 : vector<8x128xf32>
    %82 = arith.truncf %81 : vector<8x128xf32> to vector<8x128xbf16>
    %cst_48 = arith.constant dense<0.000000e+00> : vector<8x128xf32>
    %83 = tpu.matmul %82, %58, %cst_48 {dimension_numbers = #tpu.dot_dimension_numbers<[1], [0], [0], [1], [0, 0, 1, 1], [], []>} : vector<8x128xbf16>, vector<128x128xbf16>, vector<8x128xf32> -> vector<8x128xf32>
    %84 = vector.broadcast %75 : vector<1x128xf32> to vector<8x128xf32>
    %85 = arith.addf %83, %84 : vector<8x128xf32>
    %c0_49 = arith.constant 0 : index
    %c0_50 = arith.constant 0 : index
    %86 = vector.load %arg7[%c0_49, %c0_50] : memref<8x128xf32, #tpu.memory_space<vmem>>, vector<8x128xf32>
    tpu.vector_store %arg7[%c0_49, %c0_50], %85 {strides = array<i32>} : memref<8x128xf32, #tpu.memory_space<vmem>>, vector<8x128xf32>,
    return
  }
  func.func @transform_0(%arg0: i32) -> i32 {
    %c0_i32 = arith.constant 0 : i32
    %c0_i32_0 = arith.constant 0 : i32
    return %c0_i32 : i32
  }
  func.func @transform_1(%arg0: i32) -> (i32, i32) {
    %c0_i32 = arith.constant 0 : i32
    %c0_i32_0 = arith.constant 0 : i32
    return %arg0, %c0_i32 : i32, i32
  }
  func.func @transform_2(%arg0: i32) -> (i32, i32, i32) {
    %c0_i32 = arith.constant 0 : i32
    %c0_i32_0 = arith.constant 0 : i32
    %c0_i32_1 = arith.constant 0 : i32
    %c0_i32_2 = arith.constant 0 : i32
    return %c0_i32, %c0_i32_0, %c0_i32_1 : i32, i32, i32
  }
  func.func @transform_3(%arg0: i32) -> (i32, i32, i32) {
    %c0_i32 = arith.constant 0 : i32
    %c0_i32_0 = arith.constant 0 : i32
    %c0_i32_1 = arith.constant 0 : i32
    %c0_i32_2 = arith.constant 0 : i32
    return %c0_i32, %c0_i32_0, %c0_i32_1 : i32, i32, i32
  }
  func.func @transform_4(%arg0: i32) -> (i32, i32, i32) {
    %c0_i32 = arith.constant 0 : i32
    %c0_i32_0 = arith.constant 0 : i32
    %c0_i32_1 = arith.constant 0 : i32
    %c0_i32_2 = arith.constant 0 : i32
    return %c0_i32, %c0_i32_0, %c0_i32_1 : i32, i32, i32
  }
  func.func @transform_5(%arg0: i32) -> (i32, i32, i32) {
    %c0_i32 = arith.constant 0 : i32
    %c0_i32_0 = arith.constant 0 : i32
    %c0_i32_1 = arith.constant 0 : i32
    %c0_i32_2 = arith.constant 0 : i32
    return %c0_i32, %c0_i32_0, %c0_i32_1 : i32, i32, i32
  }
  func.func @transform_6(%arg0: i32) -> (i32, i32) {
    %c0_i32 = arith.constant 0 : i32
    %c0_i32_0 = arith.constant 0 : i32
    return %arg0, %c0_i32 : i32, i32
  }
}

</mosaic_0001>

<bundles_post_ra>
// kernel: curve_model_forward.1
= control target key start
LH: loop header
LB: loop body
LE: loop exit
PB: predicated region body
PF: predicated region fallthrough
CT: control target
= control target key end

     0   :  { %11 = vsyncpa [#allocation4], 0  ;;  %s1143_s0 = inlined_call_operand.vmem [shape: f32[3], index: 0, kind: input, shape index: {}]   ;;  %s1144_s1 = inlined_call_operand.vmem [shape: bf16[8,128], index: 1, kind: input, shape index: {}]   ;;  %s1145_s2 = inlined_call_operand.hbm [shape: bf16[3,128,128], index: 2, kind: input, shape index: {}]   ;;  %s1146_s3 = inlined_call_operand.vmem [shape: f32[3,1,128], index: 3, kind: input, shape index: {}]   ;;  %s1147_s4 = inlined_call_operand.hbm [shape: bf16[3,128,128], index: 4, kind: input, shape index: {}]   ;;  %s1148_s5 = inlined_call_operand.vmem [shape: f32[3,1,128], index: 5, kind: input, shape index: {}]   ;;  %s1149_s6 = inlined_call_operand.vmem [shape: f32[8,128], index: 6, kind: output, shape index: {}]  }
   0x1   :  { %12 = vsyncpa [#allocation3], 0  ;;  %s20_s23 = sshll.u32 %s1143_s0, 4  ;;  %s21_s23 = int_to_ptr.vmem [resolvable:$true] %s20_s23 }
   0x2   :  { %13 = vsyncpa [#allocation7], 0  ;;  %s871_s24 = scalar_lea.vmem %s21_s23, 16  ;;  %p876_p1 = scmp.lt.s32.totalorder %s21_s23, %s21_s23 }
   0x3   :  { %p872_p0 = scmp.ne.s32.totalorder %s21_s23, %s871_s24  ;;  %p877_p2 = scmp.lt.s32.totalorder %s871_s24, %s871_s24 }
   0x5   :  { %p878_p3 = por %p877_p2, %p876_p1 }
   0x7   :  { %p879_p4 = pnand %p878_p3, %p872_p0 }
   0x9   :  { %882 = shalt.err (!%p879_p4)
}
   0xa   :  { %s929_s25 = smov [#allocation2]   ;;  %s930_s26 = smov [#allocation5]  }
   0xb   :  { %23 = dma.vmem_to_smem %s21_s23, 16, %s929_s25, [#allocation4]  }
   0xc   :  { %s31_s27 = sshll.u32 %s930_s26, 4  ;;  %s32_s27 = int_to_ptr.vmem [resolvable:$true] %s31_s27 }
   0xd   :  { %s891_s28 = scalar_lea.vmem %s32_s27, 3072  ;;  %p896_p6 = scmp.lt.s32.totalorder %s32_s27, %s32_s27 }
   0xe   :  { %p892_p5 = scmp.ne.s32.totalorder %s32_s27, %s891_s28  ;;  %p897_p7 = scmp.lt.s32.totalorder %s891_s28, %s891_s28 }
  0x10   :  { %p898_p8 = por %p897_p7, %p896_p6 }
  0x12   :  { %p899_p9 = pnand %p898_p8, %p892_p5 }
  0x14   :  { %902 = shalt.err (!%p899_p9)
}
  0x15   :  { %s931_s0 = smov 64   ;;  %s932_s29 = smov 4  }
  0x16   :  { %37 = dma.hbm_to_vmem [thread:$0]  %s1145_s2, 3072, %s32_s27, [#allocation3], %s931_s0, %s931_s0, %s932_s29  }
  0x17   :  { %s933_s8 = smov [#allocation6]  }
  0x18   :  { %s45_s9 = sshll.u32 %s933_s8, 4  ;;  %s46_s9 = int_to_ptr.vmem [resolvable:$true] %s45_s9 }
  0x19   :  { %s911_s10 = scalar_lea.vmem %s46_s9, 3072  ;;  %p916_p11 = scmp.lt.s32.totalorder %s46_s9, %s46_s9 }
  0x1a   :  { %p912_p10 = scmp.ne.s32.totalorder %s46_s9, %s911_s10  ;;  %p917_p12 = scmp.lt.s32.totalorder %s911_s10, %s911_s10 }
  0x1c   :  { %p918_p13 = por %p917_p12, %p916_p11 }
  0x1e   :  { %p919_p0 = pnand %p918_p13, %p912_p10 }
  0x20   :  { %922 = shalt.err (!%p919_p0)
}
  0x21   :  { %51 = dma.hbm_to_vmem [thread:$0]  %s1147_s4, 3072, %s46_s9, [#allocation7], %s931_s0, %s931_s0, %s932_s29  }
  0x22   :  { %923 = dma.done.wait [#allocation4], 16  }
  0x23   :  { %924 = vsyncadd [#allocation4], 4294967280 }
  0x24   :  { %925 = dma.done.wait [#allocation3], 3072  }
  0x25   :  { %926 = vsyncadd [#allocation3], 4294964224 }
  0x26   :  { %927 = dma.done.wait [#allocation7], 3072  }
  0x27   :  { %928 = vsyncadd [#allocation7], 4294964224 }
  0x28   :  { %63 = sfence }
  0x29   :  { %s980_s2 = sld [smem:[#allocation2]]  ;;  %v770_v0 = vld [vmem:[#allocation5 + $0x38] sm:$0xff]   ;;  %v934_v3 = vmov 0.0   ;;  %v769_v8 = vld [vmem:[#allocation5 + $0x30] sm:$0xff]   ;;  %v768_v15 = vld [vmem:[#allocation5 + $0x28] sm:$0xff]   ;;  %vm935_vm0 = vmmov 0  }
  0x2a   :  { %v777_v1 = vld [vmem:[#allocation5 + $0x78] sm:$0xff]   ;;  %824 = vmatprep.subr.bf16.mxu0 %v934_v3  ;;  %v602_v4 = vunpack.c.l.bf16 %v770_v0  ;;  %v603_v5 = vunpack.c.h.bf16 %v770_v0  ;;  %s983_s13 = sld [smem:[#allocation2 + $0x1]]  ;;  %v776_v9 = vld [vmem:[#allocation5 + $0x70] sm:$0xff]   ;;  %844 = vmatprep.subr.bf16.mxu1 %v934_v3  ;;  %v598_v13 = vunpack.c.l.bf16 %v769_v8  ;;  %v599_v14 = vunpack.c.h.bf16 %v769_v8  ;;  %v775_v16 = vld [vmem:[#allocation5 + $0x68] sm:$0xff]  }
  0x2b   :  { %v784_v2 = vld [vmem:[#allocation5 + $0xb8] sm:$0xff]   ;;  %v634_v6 = vunpack.c.l.bf16 %v777_v1  ;;  %v635_v7 = vunpack.c.h.bf16 %v777_v1  ;;  %v783_v10 = vld [vmem:[#allocation5 + $0xb0] sm:$0xff]   ;;  %s986_s4 = sld [smem:[#allocation2 + $0x2]]  ;;  %v782_v17 = vld [vmem:[#allocation5 + $0xa8] sm:$0xff]   ;;  %v630_v18 = vunpack.c.l.bf16 %v776_v9  ;;  %v631_v19 = vunpack.c.h.bf16 %v776_v9  ;;  %840 = vmatprep.mubr.msk.bf16.mxu0 %vm935_vm0, %v934_v3  ;;  %860 = vmatprep.mubr.msk.bf16.mxu1 %vm935_vm0, %v934_v3 }
  0x2c   :  { %v666_v11 = vunpack.c.l.bf16 %v784_v2  ;;  %v667_v12 = vunpack.c.h.bf16 %v784_v2  ;;  %v662_v20 = vunpack.c.l.bf16 %v783_v10  ;;  %v663_v21 = vunpack.c.h.bf16 %v783_v10  ;;  %v767_v22 = vld [vmem:[#allocation5 + $0x20] sm:$0xff]  }
  0x2d   :  { %v774_v23 = vld [vmem:[#allocation5 + $0x60] sm:$0xff]   ;;  %v594_v25 = vunpack.c.l.bf16 %v768_v15  ;;  %v595_v26 = vunpack.c.h.bf16 %v768_v15  ;;  %v626_v27 = vunpack.c.l.bf16 %v775_v16  ;;  %v627_v28 = vunpack.c.h.bf16 %v775_v16  ;;  %v780_v16 = vld [vmem:[#allocation5 + $0x98] sm:$0xff]  }
  0x2e   :  { %v988_v24 = vld [vmem:[#allocation5 + $0xa0] sm:$0xff]   ;;  %v658_v29 = vunpack.c.l.bf16 %v782_v17  ;;  %v659_v30 = vunpack.c.h.bf16 %v782_v17  ;;  %v590_v31 = vunpack.c.l.bf16 %v767_v22  ;;  %v591_v32 = vunpack.c.h.bf16 %v767_v22 }
  0x2f   :  { %v991_v33 = vstv %s980_s2  ;;  %v622_v34 = vunpack.c.l.bf16 %v774_v23  ;;  %v623_v35 = vunpack.c.h.bf16 %v774_v23  ;;  %v654_v36 = vunpack.c.l.bf16 %v988_v24 }
  0x30   :  { %v113_v37 = vmul.f32 %v602_v4, %v991_v33  ;;  %v114_v38 = vmul.f32 %v603_v5, %v991_v33  ;;  %v997_v39 = vstv %s983_s13  ;;  %v111_v40 = vmul.f32 %v598_v13, %v991_v33 }
  0x31   :  { %v164_v41 = vmul.f32 %v634_v6, %v997_v39  ;;  %v165_v42 = vmul.f32 %v635_v7, %v997_v39  ;;  %v1003_v43 = vstv %s986_s4  ;;  %v112_v44 = vmul.f32 %v599_v14, %v991_v33  ;;  %v766_v6 = vld [vmem:[#allocation5 + $0x18] sm:$0xff]  }
  0x32   :  { %v231_v45 = vmul.f32 %v666_v11, %v1003_v43  ;;  %v232_v46 = vmul.f32 %v667_v12, %v1003_v43  ;;  %v162_v47 = vmul.f32 %v630_v18, %v997_v39  ;;  %v163_v48 = vmul.f32 %v631_v19, %v997_v39  ;;  %v773_v11 = vld [vmem:[#allocation5 + $0x58] sm:$0xff]  }
  0x33   :  { %v180_v49 = vadd.f32 %v164_v41, %v113_v37  ;;  %v181_v50 = vadd.f32 %v165_v42, %v114_v38  ;;  %v229_v51 = vmul.f32 %v662_v20, %v1003_v43  ;;  %v230_v52 = vmul.f32 %v663_v21, %v1003_v43  ;;  %v779_v41 = vld [vmem:[#allocation5 + $0x90] sm:$0xff]  }
  0x34   :  { %v178_v53 = vadd.f32 %v162_v47, %v111_v40  ;;  %v179_v54 = vadd.f32 %v163_v48, %v112_v44  ;;  %v109_v55 = vmul.f32 %v594_v25, %v991_v33  ;;  %v110_v56 = vmul.f32 %v595_v26, %v991_v33  ;;  %v765_v26 = vld [vmem:[#allocation5 + $0x10] sm:$0xff]   ;;  %v764_v47 = vld [vmem:[#allocation5 + $0x8] sm:$0xff]  }
  0x35   :  { %v247_v57 = vadd.f32 %v231_v45, %v180_v49  ;;  %v248_v58 = vadd.f32 %v232_v46, %v181_v50  ;;  %v160_v59 = vmul.f32 %v626_v27, %v997_v39  ;;  %v161_v60 = vmul.f32 %v627_v28, %v997_v39  ;;  %v772_v27 = vld [vmem:[#allocation5 + $0x50] sm:$0xff]  }
  0x36   :  { %v245_v61 = vadd.f32 %v229_v51, %v178_v53  ;;  %v246_v62 = vadd.f32 %v230_v52, %v179_v54  ;;  %v227_v63 = vmul.f32 %v658_v29, %v1003_v43  ;;  %v228_v0 = vmul.f32 %v659_v30, %v1003_v43  ;;  %v771_v52 = vld [vmem:[#allocation5 + $0x48] sm:$0xff]  }
  0x37   :  { %v256_v1 = vpack.c.bf16 %v248_v58, %v247_v57  ;;  %v176_v2 = vadd.f32 %v160_v59, %v109_v55  ;;  %v177_v4 = vadd.f32 %v161_v60, %v110_v56  ;;  %v107_v5 = vmul.f32 %v590_v31, %v991_v33 }
  0x38   :  { %v255_v7 = vpack.c.bf16 %v246_v62, %v245_v61  ;;  %v108_v8 = vmul.f32 %v591_v32, %v991_v33  ;;  %v158_v9 = vmul.f32 %v622_v34, %v997_v39  ;;  %v159_v10 = vmul.f32 %v623_v35, %v997_v39  ;;  %v778_v61 = vld [vmem:[#allocation5 + $0x88] sm:$0xff]  }
  0x39   :  { %825 = vmatpush3.bf16.msra.mxu0 %v256_v1  ;;  %v243_v12 = vadd.f32 %v227_v63, %v176_v2  ;;  %v244_v13 = vadd.f32 %v228_v0, %v177_v4  ;;  %v655_v14 = vunpack.c.h.bf16 %v988_v24  ;;  %v225_v15 = vmul.f32 %v654_v36, %v1003_v43  ;;  %v573_v2 = vld [vmem:[#allocation5] sm:$0xff]  }
  0x3a   :  { %826 = vmatprep.subr.bf16.mxu0 %v934_v3  ;;  %v174_v17 = vadd.f32 %v158_v9, %v107_v5  ;;  %v175_v18 = vadd.f32 %v159_v10, %v108_v8  ;;  %v586_v19 = vunpack.c.l.bf16 %v766_v6  ;;  %v587_v20 = vunpack.c.h.bf16 %v766_v6  ;;  %v605_v8 = vld [vmem:[#allocation5 + $0x40] sm:$0xff]  }
  0x3b   :  { %v254_v21 = vpack.c.bf16 %v244_v13, %v243_v12  ;;  %v226_v22 = vmul.f32 %v655_v14, %v1003_v43  ;;  %v618_v23 = vunpack.c.l.bf16 %v773_v11  ;;  %v619_v25 = vunpack.c.h.bf16 %v773_v11 }
  0x3c   :  { %v241_v28 = vadd.f32 %v225_v15, %v174_v17  ;;  %v105_v29 = vmul.f32 %v586_v19, %v991_v33  ;;  %v106_v24 = vmul.f32 %v587_v20, %v991_v33  ;;  %v650_v30 = vunpack.c.l.bf16 %v780_v16  ;;  %v637_v17 = vld [vmem:[#allocation5 + $0x80] sm:$0xff]  }
  0x3d   :  { %827 = vmatpush3.bf16.msra.mxu0 %v255_v7  ;;  %v242_v31 = vadd.f32 %v226_v22, %v175_v18  ;;  %v156_v32 = vmul.f32 %v618_v23, %v997_v39  ;;  %v157_v34 = vmul.f32 %v619_v25, %v997_v39  ;;  %v651_v35 = vunpack.c.h.bf16 %v780_v16  ;;  %v791_v22 = vld [vmem:[#allocation6 + $0x38] sm:$0xff]  }
  0x3e   :  { %828 = vmatprep.subr.bf16.mxu0 %v934_v3  ;;  %v223_v36 = vmul.f32 %v650_v30, %v1003_v43  ;;  %v582_v37 = vunpack.c.l.bf16 %v765_v26  ;;  %v583_v38 = vunpack.c.h.bf16 %v765_v26  ;;  %v614_v40 = vunpack.c.l.bf16 %v772_v27 }
  0x3f   :  { %v253_v42 = vpack.c.bf16 %v242_v31, %v241_v28  ;;  %v172_v44 = vadd.f32 %v156_v32, %v105_v29  ;;  %v173_v45 = vadd.f32 %v157_v34, %v106_v24  ;;  %v224_v46 = vmul.f32 %v651_v35, %v1003_v43  ;;  %v798_v31 = vld [vmem:[#allocation6 + $0x78] sm:$0xff]  }
  0x40   :  { %v103_v48 = vmul.f32 %v582_v37, %v991_v33  ;;  %v104_v49 = vmul.f32 %v583_v38, %v991_v33  ;;  %v615_v50 = vunpack.c.h.bf16 %v772_v27  ;;  %v154_v51 = vmul.f32 %v614_v40, %v997_v39 }
  0x41   :  { %829 = vmatpush3.bf16.msra.mxu0 %v254_v21  ;;  %v239_v53 = vadd.f32 %v223_v36, %v172_v44  ;;  %v240_v54 = vadd.f32 %v224_v46, %v173_v45  ;;  %v646_v55 = vunpack.c.l.bf16 %v779_v41  ;;  %v647_v56 = vunpack.c.h.bf16 %v779_v41  ;;  %v805_v41 = vld [vmem:[#allocation6 + $0xb8] sm:$0xff]  }
  0x42   :  { %830 = vmatprep.subr.bf16.mxu0 %v934_v3  ;;  %v155_v57 = vmul.f32 %v615_v50, %v997_v39  ;;  %v170_v58 = vadd.f32 %v154_v51, %v103_v48  ;;  %v578_v59 = vunpack.c.l.bf16 %v764_v47  ;;  %v579_v60 = vunpack.c.h.bf16 %v764_v47  ;;  %v797_v48 = vld [vmem:[#allocation6 + $0x70] sm:$0xff]  }
  0x43   :  { %v252_v62 = vpack.c.bf16 %v240_v54, %v239_v53  ;;  %v221_v63 = vmul.f32 %v646_v55, %v1003_v43  ;;  %v222_v0 = vmul.f32 %v647_v56, %v1003_v43  ;;  %v610_v1 = vunpack.c.l.bf16 %v771_v52 }
  0x44   :  { %v171_v4 = vadd.f32 %v155_v57, %v104_v49  ;;  %v101_v5 = vmul.f32 %v578_v59, %v991_v33  ;;  %v102_v6 = vmul.f32 %v579_v60, %v991_v33  ;;  %v611_v7 = vunpack.c.h.bf16 %v771_v52 }
  0x45   :  { %831 = vmatpush3.bf16.msra.mxu0 %v253_v42  ;;  %v237_v9 = vadd.f32 %v221_v63, %v170_v58  ;;  %v152_v10 = vmul.f32 %v610_v1, %v997_v39  ;;  %v642_v11 = vunpack.c.l.bf16 %v778_v61  ;;  %v643_v12 = vunpack.c.h.bf16 %v778_v61  ;;  %v790_v42 = vld [vmem:[#allocation6 + $0x30] sm:$0xff]  }
  0x46   :  { %832 = vmatprep.subr.bf16.mxu0 %v934_v3  ;;  %v238_v13 = vadd.f32 %v222_v0, %v171_v4  ;;  %v153_v14 = vmul.f32 %v611_v7, %v997_v39  ;;  %v574_v15 = vunpack.c.l.bf16 %v573_v2  ;;  %v575_v16 = vunpack.c.h.bf16 %v573_v2  ;;  %v804_v61 = vld [vmem:[#allocation6 + $0xb0] sm:$0xff]   ;;  %v789_v2 = vld [vmem:[#allocation6 + $0x28] sm:$0xff]  }
  0x47   :  { %v168_v18 = vadd.f32 %v152_v10, %v101_v5  ;;  %v219_v19 = vmul.f32 %v642_v11, %v1003_v43  ;;  %v220_v20 = vmul.f32 %v643_v12, %v1003_v43  ;;  %v606_v21 = vunpack.c.l.bf16 %v605_v8 }
  0x48   :  { %v251_v23 = vpack.c.bf16 %v238_v13, %v237_v9  ;;  %v169_v25 = vadd.f32 %v153_v14, %v102_v6  ;;  %v99_v26 = vmul.f32 %v574_v15, %v991_v33  ;;  %v100_v27 = vmul.f32 %v575_v16, %v991_v33 }
  0x49   :  { %833 = vmatpush3.bf16.msra.mxu0 %v252_v62  ;;  %v235_v28 = vadd.f32 %v219_v19, %v168_v18  ;;  %v607_v29 = vunpack.c.h.bf16 %v605_v8  ;;  %v150_v24 = vmul.f32 %v606_v21, %v997_v39  ;;  %v638_v30 = vunpack.c.l.bf16 %v637_v17  ;;  %v796_v8 = vld [vmem:[#allocation6 + $0x68] sm:$0xff]  }
  0x4a   :  { %834 = vmatprep.subr.bf16.mxu0 %v934_v3  ;;  %v236_v32 = vadd.f32 %v220_v20, %v169_v25  ;;  %v639_v34 = vunpack.c.h.bf16 %v637_v17  ;;  %v698_v35 = vunpack.c.l.bf16 %v791_v22  ;;  %v699_v40 = vunpack.c.h.bf16 %v791_v22  ;;  %v803_v17 = vld [vmem:[#allocation6 + $0xa8] sm:$0xff]   ;;  %v788_v22 = vld [vmem:[#allocation6 + $0x20] sm:$0xff]  }
  0x4b   :  { %v151_v36 = vmul.f32 %v607_v29, %v997_v39  ;;  %v166_v37 = vadd.f32 %v150_v24, %v99_v26  ;;  %v217_v38 = vmul.f32 %v638_v30, %v1003_v43  ;;  %v730_v47 = vunpack.c.l.bf16 %v798_v31  ;;  %v795_v29 = vld [vmem:[#allocation6 + $0x60] sm:$0xff]  }
  0x4c   :  { %v250_v44 = vpack.c.bf16 %v236_v32, %v235_v28  ;;  %v218_v45 = vmul.f32 %v639_v34, %v1003_v43  ;;  %v313_v46 = vmul.f32 %v698_v35, %v991_v33  ;;  %v314_v51 = vmul.f32 %v699_v40, %v991_v33 }
  0x4d   :  { %835 = vmatpush3.bf16.msra.mxu0 %v251_v23  ;;  %v167_v49 = vadd.f32 %v151_v36, %v100_v27  ;;  %v233_v50 = vadd.f32 %v217_v38, %v166_v37  ;;  %v731_v52 = vunpack.c.h.bf16 %v798_v31  ;;  %v362_v53 = vmul.f32 %v730_v47, %v997_v39  ;;  %v463_v23 = vld [vmem:[%s1144_s1] sm:$0xf] }
  0x4e   :  { %836 = vmatprep.subr.bf16.mxu0 %v934_v3  ;;  %v762_v54 = vunpack.c.l.bf16 %v805_v41  ;;  %v763_v55 = vunpack.c.h.bf16 %v805_v41  ;;  %v694_v56 = vunpack.c.l.bf16 %v790_v42  ;;  %v695_v59 = vunpack.c.h.bf16 %v790_v42 }
  0x4f   :  { %v234_v57 = vadd.f32 %v218_v45, %v167_v49  ;;  %v363_v58 = vmul.f32 %v731_v52, %v997_v39  ;;  %v726_v60 = vunpack.c.l.bf16 %v797_v48  ;;  %v378_v62 = vadd.f32 %v362_v53, %v313_v46  ;;  %v787_v45 = vld [vmem:[#allocation6 + $0x18] sm:$0xff]  }
  0x50   :  { %v427_v63 = vmul.f32 %v762_v54, %v1003_v43  ;;  %v428_v0 = vmul.f32 %v763_v55, %v1003_v43  ;;  %v311_v1 = vmul.f32 %v694_v56, %v991_v33  ;;  %v312_v6 = vmul.f32 %v695_v59, %v991_v33 }
  0x51   :  { %837 = vmatpush3.bf16.msra.mxu0 %v250_v44  ;;  %v249_v4 = vpack.c.bf16 %v234_v57, %v233_v50  ;;  %v379_v5 = vadd.f32 %v363_v58, %v314_v51  ;;  %v727_v7 = vunpack.c.h.bf16 %v797_v48  ;;  %v360_v10 = vmul.f32 %v726_v60, %v997_v39  ;;  %v802_v44 = vld [vmem:[#allocation6 + $0xa0] sm:$0xff]   ;;  %v794_v50 = vld [vmem:[#allocation6 + $0x58] sm:$0xff]  }
  0x52   :  { %838 = vmatprep.subr.bf16.mxu0 %v934_v3  ;;  %v443_v9 = vadd.f32 %v427_v63, %v378_v62  ;;  %v758_v11 = vunpack.c.l.bf16 %v804_v61  ;;  %v759_v12 = vunpack.c.h.bf16 %v804_v61  ;;  %v690_v15 = vunpack.c.l.bf16 %v789_v2  ;;  %v801_v63 = vld [vmem:[#allocation6 + $0x98] sm:$0xff]  }
  0x53   :  { %v444_v13 = vadd.f32 %v428_v0, %v379_v5  ;;  %v361_v14 = vmul.f32 %v727_v7, %v997_v39  ;;  %v691_v16 = vunpack.c.h.bf16 %v789_v2  ;;  %v376_v18 = vadd.f32 %v360_v10, %v311_v1  ;;  %v786_v0 = vld [vmem:[#allocation6 + $0x10] sm:$0xff]  }
  0x54   :  { %v425_v19 = vmul.f32 %v758_v11, %v1003_v43  ;;  %v426_v20 = vmul.f32 %v759_v12, %v1003_v43  ;;  %v722_v21 = vunpack.c.l.bf16 %v796_v8  ;;  %v309_v27 = vmul.f32 %v690_v15, %v991_v33  ;;  %v793_v10 = vld [vmem:[#allocation6 + $0x50] sm:$0xff]  }
  0x55   :  { %839 = vmatpush3.bf16.msra.mxu0 %v249_v4  ;;  %v452_v25 = vpack.c.bf16 %v444_v13, %v443_v9  ;;  %v377_v26 = vadd.f32 %v361_v14, %v312_v6  ;;  %v310_v28 = vmul.f32 %v691_v16, %v991_v33  ;;  %v723_v30 = vunpack.c.h.bf16 %v796_v8 }
  0x56   :  { %v441_v24 = vadd.f32 %v425_v19, %v376_v18  ;;  %v358_v31 = vmul.f32 %v722_v21, %v997_v39  ;;  %v754_v32 = vunpack.c.l.bf16 %v803_v17  ;;  %v755_v35 = vunpack.c.h.bf16 %v803_v17  ;;  %v800_v19 = vld [vmem:[#allocation6 + $0x90] sm:$0xff]  }
  0x57   :  { %845 = vmatpush3.bf16.msra.mxu1 %v452_v25  ;;  %v442_v34 = vadd.f32 %v426_v20, %v377_v26  ;;  %v686_v36 = vunpack.c.l.bf16 %v788_v22  ;;  %v687_v37 = vunpack.c.h.bf16 %v788_v22  ;;  %v359_v38 = vmul.f32 %v723_v30, %v997_v39 }
  0x58   :  { %841 = vmatmul.mubr.bf16.vlgmr.msra.gmra.mxu0 %v463_v23  ;;  %846 = vmatprep.subr.bf16.mxu1 %v934_v3  ;;  %v374_v40 = vadd.f32 %v358_v31, %v309_v27  ;;  %v423_v41 = vmul.f32 %v754_v32, %v1003_v43  ;;  %v718_v42 = vunpack.c.l.bf16 %v795_v29  ;;  %v424_v47 = vmul.f32 %v755_v35, %v1003_v43 }
  0x59   :  { %v451_v46 = vpack.c.bf16 %v442_v34, %v441_v24  ;;  %v307_v48 = vmul.f32 %v686_v36, %v991_v33  ;;  %v308_v49 = vmul.f32 %v687_v37, %v991_v33  ;;  %v375_v51 = vadd.f32 %v359_v38, %v310_v28 }
  0x5a   :  { %v439_v52 = vadd.f32 %v423_v41, %v374_v40  ;;  %v719_v53 = vunpack.c.h.bf16 %v795_v29  ;;  %v356_v54 = vmul.f32 %v718_v42, %v997_v39  ;;  %v750_v55 = vunpack.c.l.bf16 %v802_v44 }
  0x5b   :  { %847 = vmatpush3.bf16.msra.mxu1 %v451_v46  ;;  %v751_v56 = vunpack.c.h.bf16 %v802_v44  ;;  %v682_v57 = vunpack.c.l.bf16 %v787_v45  ;;  %v683_v58 = vunpack.c.h.bf16 %v787_v45  ;;  %v440_v59 = vadd.f32 %v424_v47, %v375_v51  ;;  %v785_v45 = vld [vmem:[#allocation6 + $0x8] sm:$0xff]  }
  0x5c   :  { %848 = vmatprep.subr.bf16.mxu1 %v934_v3  ;;  %v357_v60 = vmul.f32 %v719_v53, %v997_v39  ;;  %v372_v61 = vadd.f32 %v356_v54, %v307_v48  ;;  %v714_v62 = vunpack.c.l.bf16 %v794_v50  ;;  %v421_v1 = vmul.f32 %v750_v55, %v1003_v43  ;;  %v792_v46 = vld [vmem:[#allocation6 + $0x48] sm:$0xff]  }
  0x5d   :  { %v422_v2 = vmul.f32 %v751_v56, %v1003_v43  ;;  %v305_v4 = vmul.f32 %v682_v57, %v991_v33  ;;  %v306_v5 = vmul.f32 %v683_v58, %v991_v33  ;;  %v450_v6 = vpack.c.bf16 %v440_v59, %v439_v52  ;;  %v799_v51 = vld [vmem:[#allocation6 + $0x88] sm:$0xff]   ;;  %v669_v58 = vld [vmem:[#allocation6] sm:$0xff]  }
  0x5e   :  { %v373_v7 = vadd.f32 %v357_v60, %v308_v49  ;;  %v715_v8 = vunpack.c.h.bf16 %v794_v50  ;;  %v354_v9 = vmul.f32 %v714_v62, %v997_v39  ;;  %v437_v11 = vadd.f32 %v421_v1, %v372_v61  ;;  %v701_v59 = vld [vmem:[#allocation6 + $0x40] sm:$0xff]  }
  0x5f   :  { %v746_v12 = vunpack.c.l.bf16 %v801_v63  ;;  %v747_v13 = vunpack.c.h.bf16 %v801_v63  ;;  %v678_v14 = vunpack.c.l.bf16 %v786_v0  ;;  %849 = vmatpush3.bf16.msra.mxu1 %v450_v6  ;;  %v679_v18 = vunpack.c.h.bf16 %v786_v0 }
  0x60   :  { %v438_v15 = vadd.f32 %v422_v2, %v373_v7  ;;  %v355_v16 = vmul.f32 %v715_v8, %v997_v39  ;;  %v370_v17 = vadd.f32 %v354_v9, %v305_v4  ;;  %850 = vmatprep.subr.bf16.mxu1 %v934_v3  ;;  %v710_v23 = vunpack.c.l.bf16 %v793_v10 }
  0x61   :  { %v419_v20 = vmul.f32 %v746_v12, %v1003_v43  ;;  %v420_v21 = vmul.f32 %v747_v13, %v1003_v43  ;;  %v303_v22 = vmul.f32 %v678_v14, %v991_v33  ;;  %v304_v27 = vmul.f32 %v679_v18, %v991_v33 }
  0x62   :  { %v449_v25 = vpack.c.bf16 %v438_v15, %v437_v11  ;;  %v371_v26 = vadd.f32 %v355_v16, %v306_v5  ;;  %v711_v28 = vunpack.c.h.bf16 %v793_v10  ;;  %v352_v24 = vmul.f32 %v710_v23, %v997_v39  ;;  %v733_v5 = vld [vmem:[#allocation6 + $0x80] sm:$0xff]  }
  0x63   :  { %v435_v29 = vadd.f32 %v419_v20, %v370_v17  ;;  %v742_v30 = vunpack.c.l.bf16 %v800_v19  ;;  %v743_v31 = vunpack.c.h.bf16 %v800_v19  ;;  %v674_v47 = vunpack.c.l.bf16 %v785_v45  ;;  %v568_v23 = vld [vmem:[%s1146_s3 + $0x1] sm:$0x1] }
  0x64   :  { %851 = vmatpush3.bf16.msra.mxu1 %v449_v25  ;;  %v436_v32 = vadd.f32 %v420_v21, %v371_v26  ;;  %v353_v34 = vmul.f32 %v711_v28, %v997_v39  ;;  %v368_v35 = vadd.f32 %v352_v24, %v303_v22  ;;  %v675_v48 = vunpack.c.h.bf16 %v785_v45  ;;  %v257_v22 = vld [vmem:[%s1146_s3] sm:$0x1]  ;;  %v569_v28 = vld [vmem:[%s1146_s3 + $0x2] sm:$0x1] }
  0x65   :  { %852 = vmatprep.subr.bf16.mxu1 %v934_v3  ;;  %v417_v36 = vmul.f32 %v742_v30, %v1003_v43  ;;  %v418_v37 = vmul.f32 %v743_v31, %v1003_v43  ;;  %v706_v49 = vunpack.c.l.bf16 %v792_v46  ;;  %v707_v50 = vunpack.c.h.bf16 %v792_v46 }
  0x66   :  { %v448_v38 = vpack.c.bf16 %v436_v32, %v435_v29  ;;  %v369_v40 = vadd.f32 %v353_v34, %v304_v27  ;;  %v301_v52 = vmul.f32 %v674_v47, %v991_v33  ;;  %v302_v53 = vmul.f32 %v675_v48, %v991_v33  ;;  %v571_v47 = vld [vmem:[%s1148_s5 + $0x2] sm:$0x1] }
  0x67   :  { %v433_v41 = vadd.f32 %v417_v36, %v368_v35  ;;  %v350_v54 = vmul.f32 %v706_v49, %v997_v39  ;;  %v351_v55 = vmul.f32 %v707_v50, %v997_v39  ;;  %v738_v56 = vunpack.c.l.bf16 %v799_v51 }
  0x68   :  { %853 = vmatpush3.bf16.msra.mxu1 %v448_v38  ;;  %v434_v42 = vadd.f32 %v418_v37, %v369_v40  ;;  %v739_v57 = vunpack.c.h.bf16 %v799_v51  ;;  %v670_v62 = vunpack.c.l.bf16 %v669_v58  ;;  %v671_v63 = vunpack.c.h.bf16 %v669_v58 }
  0x69   :  { %854 = vmatprep.subr.bf16.mxu1 %v934_v3  ;;  %v366_v60 = vadd.f32 %v350_v54, %v301_v52  ;;  %v367_v61 = vadd.f32 %v351_v55, %v302_v53  ;;  %v415_v0 = vmul.f32 %v738_v56, %v1003_v43  ;;  %v702_v2 = vunpack.c.l.bf16 %v701_v59 }
  0x6a   :  { %v447_v44 = vpack.c.bf16 %v434_v42, %v433_v41  ;;  %v416_v1 = vmul.f32 %v739_v57, %v1003_v43  ;;  %v703_v4 = vunpack.c.h.bf16 %v701_v59  ;;  %v299_v6 = vmul.f32 %v670_v62, %v991_v33  ;;  %v453_v42 = vld [vmem:[%s1148_s5] sm:$0x1] }
  0x6b   :  { %v300_v7 = vmul.f32 %v671_v63, %v991_v33  ;;  %v734_v8 = vunpack.c.l.bf16 %v733_v5  ;;  %v735_v9 = vunpack.c.h.bf16 %v733_v5  ;;  %v431_v10 = vadd.f32 %v415_v0, %v366_v60 }
  0x6c   :  { %855 = vmatpush3.bf16.msra.mxu1 %v447_v44  ;;  %v432_v11 = vadd.f32 %v416_v1, %v367_v61  ;;  %v348_v12 = vmul.f32 %v702_v2, %v997_v39  ;;  %v349_v13 = vmul.f32 %v703_v4, %v997_v39  ;;  %v258_v25 = vmul.f32 %v257_v22, %v991_v33  ;;  %v570_v44 = vld [vmem:[%s1148_s5 + $0x1] sm:$0x1] }
  0x6d   :  { %856 = vmatprep.subr.bf16.mxu1 %v934_v3  ;;  %v413_v14 = vmul.f32 %v734_v8, %v1003_v43  ;;  %v414_v15 = vmul.f32 %v735_v9, %v1003_v43  ;;  %v261_v26 = vmul.f32 %v568_v23, %v997_v39  ;;  %v465_v27 = vlaneseq }
  0x6e   :  { %v446_v16 = vpack.c.bf16 %v432_v11, %v431_v10  ;;  %v364_v17 = vadd.f32 %v348_v12, %v299_v6  ;;  %v365_v18 = vadd.f32 %v349_v13, %v300_v7  ;;  %v265_v29 = vmul.f32 %v569_v28, %v1003_v43 }
  0x6f   :  { %v466_v24 = vshrl.u32 %v465_v27, 7  ;;  %v454_v45 = vmul.f32 %v453_v42, %v991_v33  ;;  %v457_v46 = vmul.f32 %v570_v44, %v997_v39  ;;  %v461_v49 = vmul.f32 %v571_v47, %v1003_v43 }
  0x70   :  { %857 = vmatpush3.bf16.msra.mxu1 %v446_v16  ;;  %v429_v19 = vadd.f32 %v413_v14, %v364_v17  ;;  %v430_v20 = vadd.f32 %v414_v15, %v365_v18 }
  0x71   :  { %858 = vmatprep.subr.bf16.mxu1 %v934_v3  ;;  %v262_v3 = vadd.f32 %v261_v26, %v258_v25  ;;  %v467_v31 = vsub.s32 0, %v466_v24  ;;  %v458_v48 = vadd.f32 %v457_v46, %v454_v45 }
  0x72   :  { %v445_v21 = vpack.c.bf16 %v430_v20, %v429_v19 }
  0x73   :  { %v266_v30 = vadd.f32 %v265_v29, %v262_v3  ;;  %v462_v50 = vadd.f32 %v461_v49, %v458_v48 }
  0x74   :  { %859 = vmatpush3.bf16.msra.mxu1 %v445_v21 }
  0x75   :  { %v468_v32 = vrot.slane %v266_v30, %v467_v31  ;;  %v516_v51 = vrot.slane %v462_v50, %v467_v31 }
 0x118   :  { %v504_v34 = vpop.f32.mrf.mxu0 }
 0x119   :  { %v505_v35 = vadd.f32 %v504_v34, %v468_v32 }
 0x11a   :  { %v842_v36 = vpop.f32.mrf.mxu0 }
 0x11b   :  { %v510_v37 = vmax.f32 %v505_v35, 0.0 }
 0x11c   :  { %v507_v38 = vpop.f32.mrf.mxu0 }
 0x11d   :  { %v511_v40 = vpack.c.bf16 %v510_v37, %v510_v37 }
 0x11e   :  { %v843_v41 = vpop.f32.mrf.mxu0 }
 0x11f   :  { %861 = vmatmul.mubr.bf16.vlgmr.msra.gmra.mxu1 %v511_v40 }
 0x1df   :  { %v552_v52 = vpop.f32.mrf.mxu1 }
 0x1e0   :  { %v553_v53 = vadd.f32 %v552_v52, %v516_v51 }
 0x1e1   :  { %v862_v54 = vpop.f32.mrf.mxu1 }
 0x1e2   :  { %558 = vst [vmem:[%s1149_s6] sm:$0xff] %v553_v53 }
 0x1e3   :  { %v555_v55 = vpop.f32.mrf.mxu1 }
 0x1e5   :  { %v863_v33 = vpop.f32.mrf.mxu1 }
 0x1e6   :  { %563 = vsyncpa [#allocation3], 1 }
 0x1e7   :  { %564 = vsyncpa [#allocation7], 1 }
 0x1e8   :  { %565 = vsyncpa [#allocation4], 1 }

</bundles_post_ra>
